<compile_context>
chip_gen: v7x
topology: tpu7x:2x2x1
jax: 0.10.0
libtpu: 0.0.40
codegen_flags: <defaults>
</compile_context>

<pallas_src>
import math
import functools

import jax
import jax.numpy as jnp
from jax import lax
from jax.experimental import pallas as pl
from jax.experimental.pallas import tpu as pltpu


def _projection_head_kernel(x_ref, w1_ref, b1_ref, w2_ref, b2_ref,
                            gamma_ref, beta_ref, o_ref, *, eps,
                            approximate_gelu):
    # x_ref:  (TB, E) f32/bf16   w1_ref: (E, P) bf16   b1_ref: (1, P) f32
    # w2_ref: (P, P)  bf16       b2_ref: (1, P) f32    gamma/beta: (1, P) f32
    # o_ref:  (TB, P) f32/bf16

    # In-kernel bf16 cast for the MXU (VPU op, hidden under DMA/MXU); the
    # input tile arrives in its native dtype so no extra wrapper HBM pass.
    x_bf = x_ref[...].astype(jnp.bfloat16)

    # projection = x @ W1 + b1     (bf16 MXU inputs, f32 accumulation)
    projected = jnp.dot(x_bf, w1_ref[...],
                        preferred_element_type=jnp.float32) + b1_ref[...]

    if approximate_gelu:
        # tanh-approx GELU: routes the transcendental to the EUP slot
        # (useful on v5e); numerics differ slightly from exact GELU.
        c = math.sqrt(2.0 / math.pi)
        g = 0.5 * projected * (
            1.0 + jnp.tanh(c * (projected + 0.044715 * projected ** 3)))
    else:
        # exact GELU: 0.5 * x * (1 + erf(x / sqrt(2)))  (PyTorch default)
        g = 0.5 * projected * (
            1.0 + lax.erf(projected * (1.0 / math.sqrt(2.0))))

    # fc = gelu @ W2 + b2          (cast activation to bf16 for the MXU)
    h = jnp.dot(g.astype(jnp.bfloat16), w2_ref[...],
                preferred_element_type=jnp.float32) + b2_ref[...]

    # TODO(synk): nn.Dropout is identity in eval mode; training-time dropout
    # (pltpu.prng_random_bits mask) is not implemented here.

    # residual
    h = h + projected

    # LayerNorm over last dim (biased variance, PyTorch semantics), f32.
    # Single-pass statistics: var = E[h^2] - mean^2 (halves XLU reductions,
    # drops one (TB, P) f32 temporary).
    mean = jnp.mean(h, axis=-1, keepdims=True)
    mean_sq = jnp.mean(h * h, axis=-1, keepdims=True)
    var = mean_sq - mean * mean
    inv = lax.rsqrt(var + eps)
    o_ref[...] = ((h - mean) * (inv * gamma_ref[...])
                  + beta_ref[...]).astype(o_ref.dtype)


def prepare_params(params):
    """One-time parameter cast/reshape, hoisted out of the per-call path.

    Returns bf16 weight matrices (MXU operands) and (1, P)-shaped f32 vectors.
    """
    P = params["w1"].shape[1]
    return {
        "w1": params["w1"].astype(jnp.bfloat16),
        "w2": params["w2"].astype(jnp.bfloat16),
        "b1": params["b1"].astype(jnp.float32).reshape(1, P),
        "b2": params["b2"].astype(jnp.float32).reshape(1, P),
        "gamma": params["gamma"].astype(jnp.float32).reshape(1, P),
        "beta": params["beta"].astype(jnp.float32).reshape(1, P),
    }


def _is_v5e():
    try:
        kind = jax.devices()[0].device_kind.lower()
        return ("v5 lite" in kind) or ("v5e" in kind) or ("v5litepod" in kind)
    except Exception:
        return False


def _round_up(x, m):
    return ((x + m - 1) // m) * m


def projection_head_forward(x, params, *, block_b=512, eps=1e-5,
                            approximate_gelu=None, out_dtype=None):
    """x: [B, E].  params: dict with w1, b1, w2, b2, gamma, beta.

    Accepts either raw f32 params or the output of prepare_params().
    MXU operands (x, W1, W2) are bf16 with f32 accumulation; bias adds, GELU,
    residual and LayerNorm are computed in float32.  Numerics match a float32
    PyTorch ProjectionHead up to bf16 rounding of the matmul operands.
    """
    B, E = x.shape
    P = params["w1"].shape[1]

    # Hoisted weight prep (no-op if params already prepared).
    if params["w1"].dtype != jnp.bfloat16 or params["b1"].ndim != 2:
        params = prepare_params(params)

    if approximate_gelu is None:
        approximate_gelu = _is_v5e()
    if out_dtype is None:
        out_dtype = x.dtype
    out_dtype = jnp.dtype(out_dtype)

    # ---- batch tile -------------------------------------------------------
    # Big tiles amortize the ~0.35 us per-grid-step overhead; multiples of
    # 256 keep whole MXU M-tiles on v6e/v7x, multiples of 16 keep bf16
    # sublane packing clean for small batches.
    tb = min(block_b, _round_up(B, 16))
    if tb >= 256:
        tb = (tb // 256) * 256
    else:
        tb = _round_up(tb, 16)
    # Ensure >= 2 grid steps so both v7x TensorCores get work ("parallel"
    # axes are sharded across cores); harmless on 1-TC chips.
    if pl.cdiv(B, tb) < 2 and B > 16:
        tb = _round_up(pl.cdiv(B, 2), 16)
    grid = (pl.cdiv(B, tb),)   # ragged last block handled by Pallas masking

    x_bytes = jnp.dtype(x.dtype).itemsize
    o_bytes = out_dtype.itemsize

    # VMEM budget: double-buffered x/out tiles + resident weights + room for
    # the f32 intermediates, with headroom; keep a v7x-safe (64 MiB) ceiling.
    vmem_bytes = int(1.5 * (
        2 * tb * E * x_bytes +          # x tiles (double-buffered)
        2 * tb * P * o_bytes +          # out tiles (double-buffered)
        E * P * 2 + P * P * 2 +         # W1, W2 (bf16, resident)
        4 * P * 4 +                     # b1, b2, gamma, beta
        5 * tb * P * 4                  # in-kernel f32 intermediates
    )) + (4 << 20)
    vmem_bytes = min(vmem_bytes, 40 << 20)

    cost = pl.CostEstimate(
        flops=2 * B * E * P + 2 * B * P * P,
        transcendentals=2 * B * P,                     # erf/tanh + rsqrt
        bytes_accessed=(B * E * x_bytes + E * P * 2 + P * P * 2
                        + 4 * P * 4 + B * P * o_bytes),
    )

    kernel = functools.partial(_projection_head_kernel, eps=eps,
                               approximate_gelu=approximate_gelu)

    return pl.pallas_call(
        kernel,
        out_shape=jax.ShapeDtypeStruct((B, P), out_dtype),
        grid_spec=pltpu.PrefetchScalarGridSpec(
            num_scalar_prefetch=0,
            grid=grid,
            in_specs=[
                pl.BlockSpec((tb, E), lambda i: (i, 0)),   # x tile
                pl.BlockSpec((E, P), lambda i: (0, 0)),    # W1 (resident)
                pl.BlockSpec((1, P), lambda i: (0, 0)),    # b1
                pl.BlockSpec((P, P), lambda i: (0, 0)),    # W2 (resident)
                pl.BlockSpec((1, P), lambda i: (0, 0)),    # b2
                pl.BlockSpec((1, P), lambda i: (0, 0)),    # gamma
                pl.BlockSpec((1, P), lambda i: (0, 0)),    # beta
            ],
            out_specs=pl.BlockSpec((tb, P), lambda i: (i, 0)),
        ),
        compiler_params=pltpu.CompilerParams(
            dimension_semantics=("parallel",),
            vmem_limit_bytes=vmem_bytes),
        cost_estimate=cost,
    )(x, params["w1"], params["b1"], params["w2"], params["b2"],
      params["gamma"], params["beta"])


def init_params(key, embedding_dim, projection_dim):
    """Deterministic init mirroring nn.Linear default (uniform +/- 1/sqrt(fan_in))."""
    k1, k2, k3, k4 = jax.random.split(key, 4)
    lim1 = 1.0 / math.sqrt(embedding_dim)
    lim2 = 1.0 / math.sqrt(projection_dim)
    return {
        "w1": jax.random.uniform(k1, (embedding_dim, projection_dim),
                                 jnp.float32, -lim1, lim1),
        "b1": jax.random.uniform(k2, (projection_dim,), jnp.float32, -lim1, lim1),
        "w2": jax.random.uniform(k3, (projection_dim, projection_dim),
                                 jnp.float32, -lim2, lim2),
        "b2": jax.random.uniform(k4, (projection_dim,), jnp.float32, -lim2, lim2),
        "gamma": jnp.ones((projection_dim,), jnp.float32),
        "beta": jnp.zeros((projection_dim,), jnp.float32),
    }


def reference_forward(x, params, eps=1e-5):
    """Pure-JAX reference applying the same bf16 rounding of MXU operands."""
    P = params["w1"].shape[1]
    xb = x.astype(jnp.bfloat16).astype(jnp.float32)
    w1 = params["w1"].astype(jnp.bfloat16).astype(jnp.float32)
    w2 = params["w2"].astype(jnp.bfloat16).astype(jnp.float32)
    b1 = params["b1"].astype(jnp.float32).reshape(1, P)
    b2 = params["b2"].astype(jnp.float32).reshape(1, P)
    gamma = params["gamma"].astype(jnp.float32).reshape(1, P)
    beta = params["beta"].astype(jnp.float32).reshape(1, P)
    projected = xb @ w1 + b1
    g = 0.5 * projected * (1.0 + lax.erf(projected / math.sqrt(2.0)))
    gb = g.astype(jnp.bfloat16).astype(jnp.float32)
    h = gb @ w2 + b2
    h = h + projected
    mean = jnp.mean(h, axis=-1, keepdims=True)
    var = jnp.mean((h - mean) ** 2, axis=-1, keepdims=True)
    return (h - mean) / jnp.sqrt(var + eps) * gamma + beta


if __name__ == "__main__":
    # Text-branch shapes of the module (text_embedding=768 -> projection_dim=256)
    # with a small, non-tile-aligned batch to exercise the ragged-last-block path.
    B, E, P = 50, 768, 256

    key = jax.random.PRNGKey(0)
    kx, kp = jax.random.split(key)
    x = jax.random.normal(kx, (B, E), jnp.float32)
    params = init_params(kp, E, P)
    prepared = prepare_params(params)   # hoisted one-time weight casts

    ref = reference_forward(x, params)

    # Default tiling: tile split so the grid has 2 steps (v7x 2-core path),
    # ragged last block (50 = 32 + 18); exact erf GELU for parity check.
    out1 = jax.block_until_ready(
        projection_head_forward(x, prepared, approximate_gelu=False))
    # Small explicit tile: 4 grid steps, ragged last block of 2 rows.
    out2 = jax.block_until_ready(
        projection_head_forward(x, prepared, block_b=16, approximate_gelu=False))
    # bf16 output variant (halves writeback HBM traffic).
    out3 = jax.block_until_ready(
        projection_head_forward(x, prepared, approximate_gelu=False,
                                out_dtype=jnp.bfloat16))

    assert out1.shape == (B, P) and out2.shape == (B, P) and out3.shape == (B, P)
    assert out1.dtype == jnp.float32 and out3.dtype == jnp.bfloat16

    err1 = float(jnp.max(jnp.abs(out1 - ref)))
    err2 = float(jnp.max(jnp.abs(out2 - ref)))
    err3 = float(jnp.max(jnp.abs(out3.astype(jnp.float32) - ref)))
    assert err1 < 2e-2, err1
    assert err2 < 2e-2, err2
    assert err3 < 5e-2, err3

    print("KERNEL_OK")
</pallas_src>

<mosaic_0001>
module attributes {stable_mosaic.version = 11 : i64} {
  func.func @_projection_head_kernel(%arg0: i32, %arg1: memref<32x768xf32, #tpu.memory_space<vmem>>, %arg2: memref<768x256xbf16, #tpu.memory_space<vmem>>, %arg3: memref<1x256xf32, #tpu.memory_space<vmem>>, %arg4: memref<256x256xbf16, #tpu.memory_space<vmem>>, %arg5: memref<1x256xf32, #tpu.memory_space<vmem>>, %arg6: memref<1x256xf32, #tpu.memory_space<vmem>>, %arg7: memref<1x256xf32, #tpu.memory_space<vmem>>, %arg8: memref<32x256xf32, #tpu.memory_space<vmem>>) attributes {dimension_semantics = [#tpu.dimension_semantics<parallel>], iteration_bounds = array<i64: 2>, scalar_prefetch = 0 : i64, scratch_operands = 0 : i64, tpu.core_type = #tpu.core_type<tc>, window_params = [{transform_indices = @transform_0, window_bounds = array<i64: 32, 768>}, {pipeline_mode = #tpu.pipeline_mode<synchronous>, transform_indices = @transform_1, window_bounds = array<i64: 768, 256>}, {pipeline_mode = #tpu.pipeline_mode<synchronous>, transform_indices = @transform_2, window_bounds = array<i64: 1, 256>}, {pipeline_mode = #tpu.pipeline_mode<synchronous>, transform_indices = @transform_3, window_bounds = array<i64: 256, 256>}, {pipeline_mode = #tpu.pipeline_mode<synchronous>, transform_indices = @transform_4, window_bounds = array<i64: 1, 256>}, {pipeline_mode = #tpu.pipeline_mode<synchronous>, transform_indices = @transform_5, window_bounds = array<i64: 1, 256>}, {pipeline_mode = #tpu.pipeline_mode<synchronous>, transform_indices = @transform_6, window_bounds = array<i64: 1, 256>}, {transform_indices = @transform_7, window_bounds = array<i64: 32, 256>}]} {
    %c0 = arith.constant 0 : index
    %c0_0 = arith.constant 0 : index
    %0 = vector.load %arg1[%c0, %c0_0] : memref<32x768xf32, #tpu.memory_space<vmem>>, vector<32x768xf32>
    %1 = arith.truncf %0 : vector<32x768xf32> to vector<32x768xbf16>
    %c0_1 = arith.constant 0 : index
    %c0_2 = arith.constant 0 : index
    %2 = vector.load %arg2[%c0_1, %c0_2] : memref<768x256xbf16, #tpu.memory_space<vmem>>, vector<768x256xbf16>
    %cst = arith.constant dense<0.000000e+00> : vector<32x256xf32>
    %3 = tpu.matmul %1, %2, %cst {dimension_numbers = #tpu.dot_dimension_numbers<[1], [0], [0], [1], [0, 0, 1, 1], [], []>} : vector<32x768xbf16>, vector<768x256xbf16>, vector<32x256xf32> -> vector<32x256xf32>
    %c0_3 = arith.constant 0 : index
    %c0_4 = arith.constant 0 : index
    %4 = vector.load %arg3[%c0_3, %c0_4] : memref<1x256xf32, #tpu.memory_space<vmem>>, vector<1x256xf32>
    %5 = vector.broadcast %4 : vector<1x256xf32> to vector<32x256xf32>
    %6 = arith.addf %3, %5 : vector<32x256xf32>
    %cst_5 = arith.constant 5.000000e-01 : f32
    %7 = vector.broadcast %cst_5 : f32 to vector<32x256xf32>
    %8 = arith.mulf %7, %6 : vector<32x256xf32>
    %cst_6 = arith.constant 0.707106769 : f32
    %9 = vector.broadcast %cst_6 : f32 to vector<32x256xf32>
    %10 = arith.mulf %6, %9 : vector<32x256xf32>
    %11 = math.erf %10 : vector<32x256xf32>
    %cst_7 = arith.constant 1.000000e+00 : f32
    %12 = vector.broadcast %cst_7 : f32 to vector<32x256xf32>
    %13 = arith.addf %12, %11 : vector<32x256xf32>
    %14 = arith.mulf %8, %13 : vector<32x256xf32>
    %15 = arith.truncf %14 : vector<32x256xf32> to vector<32x256xbf16>
    %c0_8 = arith.constant 0 : index
    %c0_9 = arith.constant 0 : index
    %16 = vector.load %arg4[%c0_8, %c0_9] : memref<256x256xbf16, #tpu.memory_space<vmem>>, vector<256x256xbf16>
    %cst_10 = arith.constant dense<0.000000e+00> : vector<32x256xf32>
    %17 = tpu.matmul %15, %16, %cst_10 {dimension_numbers = #tpu.dot_dimension_numbers<[1], [0], [0], [1], [0, 0, 1, 1], [], []>} : vector<32x256xbf16>, vector<256x256xbf16>, vector<32x256xf32> -> vector<32x256xf32>
    %c0_11 = arith.constant 0 : index
    %c0_12 = arith.constant 0 : index
    %18 = vector.load %arg5[%c0_11, %c0_12] : memref<1x256xf32, #tpu.memory_space<vmem>>, vector<1x256xf32>
    %19 = vector.broadcast %18 : vector<1x256xf32> to vector<32x256xf32>
    %20 = arith.addf %17, %19 : vector<32x256xf32>
    %21 = arith.addf %20, %6 : vector<32x256xf32>
    %cst_13 = arith.constant dense<0.000000e+00> : vector<32xf32>
    %22 = vector.multi_reduction <add>, %21, %cst_13 [1] : vector<32x256xf32> to vector<32xf32>
    %23 = vector.shape_cast %22 : vector<32xf32> to vector<32x1xf32>
    %cst_14 = arith.constant 2.560000e+02 : f32
    %24 = vector.broadcast %cst_14 : f32 to vector<32x1xf32>
    %25 = arith.divf %23, %24 : vector<32x1xf32>
    %26 = arith.mulf %21, %21 : vector<32x256xf32>
    %cst_15 = arith.constant dense<0.000000e+00> : vector<32xf32>
    %27 = vector.multi_reduction <add>, %26, %cst_15 [1] : vector<32x256xf32> to vector<32xf32>
    %28 = vector.shape_cast %27 : vector<32xf32> to vector<32x1xf32>
    %cst_16 = arith.constant 2.560000e+02 : f32
    %29 = vector.broadcast %cst_16 : f32 to vector<32x1xf32>
    %30 = arith.divf %28, %29 : vector<32x1xf32>
    %31 = arith.mulf %25, %25 : vector<32x1xf32>
    %32 = arith.subf %30, %31 : vector<32x1xf32>
    %cst_17 = arith.constant 9.99999974E-6 : f32
    %33 = vector.broadcast %cst_17 : f32 to vector<32x1xf32>
    %34 = arith.addf %32, %33 : vector<32x1xf32>
    %35 = math.rsqrt %34 : vector<32x1xf32>
    %36 = vector.broadcast %25 : vector<32x1xf32> to vector<32x256xf32>
    %37 = arith.subf %21, %36 : vector<32x256xf32>
    %c0_18 = arith.constant 0 : index
    %c0_19 = arith.constant 0 : index
    %38 = vector.load %arg6[%c0_18, %c0_19] : memref<1x256xf32, #tpu.memory_space<vmem>>, vector<1x256xf32>
    %39 = vector.broadcast %35 : vector<32x1xf32> to vector<32x256xf32>
    %40 = vector.broadcast %38 : vector<1x256xf32> to vector<32x256xf32>
    %41 = arith.mulf %39, %40 : vector<32x256xf32>
    %42 = arith.mulf %37, %41 : vector<32x256xf32>
    %c0_20 = arith.constant 0 : index
    %c0_21 = arith.constant 0 : index
    %43 = vector.load %arg7[%c0_20, %c0_21] : memref<1x256xf32, #tpu.memory_space<vmem>>, vector<1x256xf32>
    %44 = vector.broadcast %43 : vector<1x256xf32> to vector<32x256xf32>
    %45 = arith.addf %42, %44 : vector<32x256xf32>
    %c0_22 = arith.constant 0 : index
    %c0_23 = arith.constant 0 : index
    %46 = vector.load %arg8[%c0_22, %c0_23] : memref<32x256xf32, #tpu.memory_space<vmem>>, vector<32x256xf32>
    tpu.vector_store %arg8[%c0_22, %c0_23], %45 {strides = array<i32>} : memref<32x256xf32, #tpu.memory_space<vmem>>, vector<32x256xf32>,
    return
  }
  func.func @transform_0(%arg0: i32) -> (i32, i32) {
    %c0_i32 = arith.constant 0 : i32
    %c0_i32_0 = arith.constant 0 : i32
    return %arg0, %c0_i32 : i32, i32
  }
  func.func @transform_1(%arg0: i32) -> (i32, i32) {
    %c0_i32 = arith.constant 0 : i32
    %c0_i32_0 = arith.constant 0 : i32
    %c0_i32_1 = arith.constant 0 : i32
    return %c0_i32, %c0_i32_0 : i32, i32
  }
  func.func @transform_2(%arg0: i32) -> (i32, i32) {
    %c0_i32 = arith.constant 0 : i32
    %c0_i32_0 = arith.constant 0 : i32
    %c0_i32_1 = arith.constant 0 : i32
    return %c0_i32, %c0_i32_0 : i32, i32
  }
  func.func @transform_3(%arg0: i32) -> (i32, i32) {
    %c0_i32 = arith.constant 0 : i32
    %c0_i32_0 = arith.constant 0 : i32
    %c0_i32_1 = arith.constant 0 : i32
    return %c0_i32, %c0_i32_0 : i32, i32
  }
  func.func @transform_4(%arg0: i32) -> (i32, i32) {
    %c0_i32 = arith.constant 0 : i32
    %c0_i32_0 = arith.constant 0 : i32
    %c0_i32_1 = arith.constant 0 : i32
    return %c0_i32, %c0_i32_0 : i32, i32
  }
  func.func @transform_5(%arg0: i32) -> (i32, i32) {
    %c0_i32 = arith.constant 0 : i32
    %c0_i32_0 = arith.constant 0 : i32
    %c0_i32_1 = arith.constant 0 : i32
    return %c0_i32, %c0_i32_0 : i32, i32
  }
  func.func @transform_6(%arg0: i32) -> (i32, i32) {
    %c0_i32 = arith.constant 0 : i32
    %c0_i32_0 = arith.constant 0 : i32
    %c0_i32_1 = arith.constant 0 : i32
    return %c0_i32, %c0_i32_0 : i32, i32
  }
  func.func @transform_7(%arg0: i32) -> (i32, i32) {
    %c0_i32 = arith.constant 0 : i32
    %c0_i32_0 = arith.constant 0 : i32
    return %arg0, %c0_i32 : i32, i32
  }
}

</mosaic_0001>

<bundles_post_ra>
// kernel: tpu_custom_call.1
= control target key start
LH: loop header
LB: loop body
LE: loop exit
PB: predicated region body
PF: predicated region fallthrough
CT: control target
= control target key end

     0   :  { %12 = vsyncpa [#allocation3], 0  ;;  %s2741_s0 = inlined_call_operand.hbm [shape: f32[50,768], index: 0, kind: input, shape index: {}]   ;;  %s2742_s1 = inlined_call_operand.hbm [shape: bf16[768,256], index: 1, kind: input, shape index: {}]   ;;  %s2743_s2 = inlined_call_operand.vmem [shape: f32[1,256], index: 2, kind: input, shape index: {}]   ;;  %s2744_s3 = inlined_call_operand.hbm [shape: bf16[256,256], index: 3, kind: input, shape index: {}]   ;;  %s2745_s4 = inlined_call_operand.vmem [shape: f32[1,256], index: 4, kind: input, shape index: {}]   ;;  %s2746_s5 = inlined_call_operand.vmem [shape: f32[1,256], index: 5, kind: input, shape index: {}]   ;;  %s2747_s6 = inlined_call_operand.vmem [shape: f32[1,256], index: 6, kind: input, shape index: {}]   ;;  %s2748_s7 = inlined_call_operand.hbm [shape: f32[50,256], index: 7, kind: output, shape index: {}]  }
   0x1   :  { %14 = vsyncpa [#allocation3 + $0x1], 0 }
   0x2   :  { %15 = vsyncpa [#allocation6], 0 }
   0x3   :  { %16 = vsyncpa [#allocation4], 0 }
   0x4   :  { %18 = vsyncpa [#allocation4 + $0x1], 0  ;;  %s2346_s24 = smov 0   ;;  %s2348_s25 = smov 0  }
   0x5   :  { %s2350_s26 = smov 0   ;;  %s2352_s27 = smov 0  }
   0x6 LB: > { %s2367_s28 = sadd.s32 4294967295, %s2294_s27   ;;  %s1673_s29 = sadd.s32 4294967294, %s2294_s27   ;;  %s2294_s27 = sphi %s2352_s27, %s2772_s27   ;;  %s2290_s26 = sphi %s2350_s26, %s2776_s26   ;;  %s2286_s25 = sphi %s2348_s25, %s2775_s25   ;;  %s2282_s24 = sphi %s2346_s24, %s2774_s24  }
   0x7   : > { %s2371_s30 = sadd.s32 1, %s2294_s27   ;;  %s31_s8 = sadd.s32 1, %s2290_s26 }
   0x8   : > { %2755 = sst [smem:[#allocation12_spill]] %s2371_s30  ;;  %s28_s9 = ssub.s32 %s2294_s27, %s2371_s30 }
   0x9   : > { %p38_p0 = scmp.ne.s32.totalorder %s2290_s26, %s2286_s25  ;;  %p29_p1 = scmp.eq.s32.totalorder %s28_s9, 0 }
   0xa   : > { %p39_p2 = scmp.eq.s32.totalorder %s2294_s27, 0  ;;  %p44_p3 = scmp.ne.s32.totalorder %s2286_s25, %s2282_s24 }
   0xb   : > { %p2749_p4 = scmp.eq.s32.totalorder %s2367_s28, 0  ;;  %p194_p7 = scmp.eq.s32.totalorder %s2367_s28, 1 }
   0xc   : > { %s2383_s10 = scalar_select %p29_p1, %s2290_s26, %s31_s8  }
   0xd   : > { %p2385_p5 = por %p39_p2, %p38_p0  ;;  %p2391_p6 = por %p2749_p4, %p44_p3 }
   0xe   : > { %2756 = sst [smem:[#allocation13_spill]] %s2383_s10  ;;  %p200_p8 = scmp.eq.s32.totalorder %s1673_s29, 1 }
   0xf   : > { %s2757_s11 = scalar_select %p2385_p5, 1, 0 }
  0x10   : > { %s2758_s12 = scalar_select %p2391_p6, 1, 0 }
  0x11   : > { %p1674_p9 = scmp.ge.s32.totalorder %s2294_s27, 1  ;;  %p207_p10 = scmp.lt.s32.totalorder %s2294_s27, 3 }
  0x12   : > { %p2398_p11 = por %p194_p7, %p38_p0  ;;  %p2402_p12 = por %p200_p8, %p44_p3 }
  0x13   : > { %p2406_p13 = pnand %p1674_p9, %p207_p10  ;;  %s2296_s16 = smov [#allocation5]  }
  0x14   : > { %s2759_s13 = scalar_select %p2398_p11, 1, 0 }
  0x15   : > { %s2760_s14 = scalar_select %p2402_p12, 1, 0 }
  0x16   : > { %s2762_s15 = scalar_select %p2406_p13, 1, 0 }
  0x17   : > { %2761 = sst [smem:[#allocation14_spill]] %s2760_s14  ;;  %p1868_p1 = pneg %p2406_p13 }
  0x18   : > { %s219_s17 = sshll.u32 %s2296_s16, 4  ;;  %s2297_s19 = smov [#allocation7]   ;;  %s220_s17 = int_to_ptr.vmem [resolvable:$true] %s219_s17 }
  0x19   : > { %p2414_p2 = pnand %p1868_p1, %p2749_p4  ;;  %s235_s20 = sshll.u32 %s2297_s19, 4  ;;  %s2418_s20 = int_to_ptr.vmem [resolvable:$true] %s235_s20 }
  0x1a   : > { %s2140_s23 = scalar_lea.hbm %s2742_s1, 12288 }
  0x1b   : > { %p2141_p0 = scmp.ne.s32.totalorder %s2742_s1, %s2140_s23  ;;  %p2142_p3 = pneg %p2414_p2 }
  0x1c   : > { %p2147_p9 = scmp.lt.u32.totalorder %s2140_s23, %s2742_s1 }
  0x1d   : > { %p2143_p7 = pnand %p2142_p3, %p2141_p0 }
  0x1f   : > { %p2144_p8 = pneg %p2143_p7 }
  0x21   : > { %p2149_p10 = pnand %p2147_p9, %p2144_p8 }
  0x23   : > { %2152 = shalt.err (!%p2149_p10)
}
  0x24   : > { %s2153_s19 = scalar_lea.vmem %s220_s17, 12288  ;;  %p2161_p11 = scmp.lt.s32.totalorder %s220_s17, %s220_s17 }
  0x25   : > { %p2154_p1 = scmp.ne.s32.totalorder %s220_s17, %s2153_s19  ;;  %p2162_p6 = scmp.lt.s32.totalorder %s2153_s19, %s2153_s19 }
  0x27   : > { %p2156_p4 = pnand %p2154_p1, %p2142_p3  ;;  %p2163_p13 = por %p2162_p6, %p2161_p11 }
  0x29   : > { %p2157_p12 = pneg %p2156_p4 }
  0x2b   : > { %p2164_p5 = pnand %p2163_p13, %p2157_p12 }
  0x2d   : > { %2167 = shalt.err (!%p2164_p5)
}
  0x2e   : > { %s2298_s21 = smov 128   ;;  %s2299_s22 = smov 8  }
  0x2f   : > { %1871 = dma.hbm_to_vmem [thread:$0]  (!%p2414_p2), %s2742_s1, 12288, %s220_s17, [#allocation6], %s2298_s21, %s2298_s21, %s2299_s22  }
  0x30   : > { %s2168_s16 = scalar_lea.hbm %s2744_s3, 4096 }
  0x31   : > { %p2169_p4 = scmp.ne.s32.totalorder %s2744_s3, %s2168_s16  ;;  %p2175_p11 = scmp.lt.u32.totalorder %s2168_s16, %s2744_s3 }
  0x33   : > { %p2171_p5 = pnand %p2169_p4, %p2142_p3 }
  0x35   : > { %p2172_p6 = pneg %p2171_p5 }
  0x37   : > { %p2177_p12 = pnand %p2175_p11, %p2172_p6 }
  0x39   : > { %2180 = shalt.err (!%p2177_p12)
}
  0x3a   : > { %s2181_s17 = scalar_lea.vmem %s2418_s20, 4096  ;;  %p2189_p8 = scmp.lt.s32.totalorder %s2418_s20, %s2418_s20 }
  0x3b   : > { %p2182_p13 = scmp.ne.s32.totalorder %s2418_s20, %s2181_s17  ;;  %p2190_p9 = scmp.lt.s32.totalorder %s2181_s17, %s2181_s17 }
  0x3d   : > { %p2184_p0 = pnand %p2182_p13, %p2142_p3  ;;  %p2191_p10 = por %p2190_p9, %p2189_p8 }
  0x3f   : > { %p2185_p7 = pneg %p2184_p0 }
  0x41   : > { %p2192_p1 = pnand %p2191_p10, %p2185_p7 }
  0x43   : > { %2195 = shalt.err (!%p2192_p1)
}
  0x44   : > { %1874 = dma.hbm_to_vmem [thread:$0]  (!%p2414_p2), %s2744_s3, 4096, %s2418_s20, [#allocation6], %s2298_s21, %s2298_s21, %s2299_s22  }
  0x45   : > { %p1677_p4 = scmp.ge.s32.totalorder %s2294_s27, 2 }
  0x46   : > { %p2764_p3 = scmp.ne.s32.totalorder (!%p1677_p4), %s2757_s11, 0 }
  0x47   : > { %254 = sbr.rel (%p1677_p4) target bundleno = 114 (0x72), region = 40 }
  0x4e   : > { %257 = sbr.rel (!%p2764_p3) target bundleno = 114 (0x72), region = 44  ;;  %s258_s14 = sand.u32 (%p2764_p3), 1, %s2290_s26  }
  0x4f   : > { %s1678_s23 = sshll.u32 (%p2764_p3), %s2294_s27, 2  ;;  %s1855_s29 = smul.u32 (%p2764_p3), 192, %s258_s14 }
  0x50   : > { %s264_s8 = ssub.s32 (%p2764_p3), 7, %s1678_s23  ;;  %s2477_s21 = scalar_lea.sflag (%p2764_p3), [#allocation3], %s258_s14 }
  0x51   : > { %p265_p5 = scmp.lt.s32.totalorder (%p2764_p3), %s264_s8, 4  ;;  %s262_s22 = scalar_lea.vmem (%p2764_p3), [#allocation2], %s1855_s29 }
  0x55   : > { %s2778_s8 = smov (!%p265_p5, %s264_s8), 4 }
  0x56   : > { %s2474_s18 = smul.u32 768, %s2778_s8 }
  0x58   : > { %s270_s20 = ssub.s32 3072, %s2474_s18 }
  0x59   : > { %271 = vsyncadd %s2477_s21, %s270_s20  ;;  %p1681_p2 = scmp.ne.s32.totalorder %s2474_s18, 0  ;;  %s1856_s11 = smul.u32 3072, %s2294_s27 }
  0x5a   : > { %s277_s9 = sshll.u32 %s262_s22, 4  ;;  %s2200_s23 = scalar_lea.hbm %s2741_s0, 5376  ;;  %s2487_s9 = int_to_ptr.vmem [resolvable:$true] %s277_s9 }
  0x5b   : > { %s2485_s17 = scalar_lea.hbm %s2741_s0, %s1856_s11 }
  0x5c   : > { %s2196_s30 = scalar_lea.hbm %s2485_s17, %s2474_s18  ;;  %p2201_p13 = scmp.lt.u32.totalorder %s2485_s17, %s2741_s0 }
  0x5d   : > { %p2197_p6 = scmp.ne.s32.totalorder %s2485_s17, %s2196_s30  ;;  %p2202_p0 = scmp.lt.u32.totalorder %s2200_s23, %s2196_s30 }
  0x5e   : > { %p2204_p8 = scmp.lt.u32.totalorder %s2196_s30, %s2485_s17 }
  0x5f   : > { %p2198_p11 = pnand %p2197_p6, %p1681_p2  ;;  %p2203_p7 = por %p2202_p0, %p2201_p13 }
  0x61   : > { %p2199_p12 = pneg %p2198_p11  ;;  %p2205_p9 = por %p2204_p8, %p2203_p7 }
  0x63   : > { %p2206_p10 = pnand %p2205_p9, %p2199_p12 }
  0x65   : > { %2209 = shalt.err (!%p2206_p10)
}
  0x66   : > { %s2210_s20 = scalar_lea.vmem %s2487_s9, %s2474_s18  ;;  %s2300_s22 = smov [#allocation2]  }
  0x67   : > { %p2211_p1 = scmp.ne.s32.totalorder %s2487_s9, %s2210_s20  ;;  %s2214_s11 = sshll.u32 %s2300_s22, 4  ;;  %s2215_s11 = int_to_ptr.vmem [resolvable:$false] %s2214_s11 }
  0x68   : > { %s2216_s16 = scalar_lea.vmem %s2215_s11, 6144  ;;  %p2217_p6 = scmp.lt.s32.totalorder %s2487_s9, %s2215_s11 }
  0x69   : > { %p2212_p3 = pnand %p2211_p1, %p1681_p2  ;;  %p2218_p11 = scmp.lt.s32.totalorder %s2216_s16, %s2210_s20 }
  0x6b   : > { %p2213_p5 = pneg %p2212_p3  ;;  %p2219_p13 = por %p2218_p11, %p2217_p6 }
  0x6d   : > { %p2220_p0 = pnand %p2219_p13, %p2213_p5 }
  0x6f   : > { %2223 = shalt.err (!%p2220_p0)
}
  0x70   : > { %s2301_s19 = smov 768   ;;  %s2302_s30 = smov 48  }
  0x71   : > { %283 = dma.hbm_to_vmem [thread:$0]  (%p1681_p2), %s2485_s17, %s2474_s18, %s2487_s9, %s2477_s21, %s2301_s19, %s2301_s19, %s2302_s30  }
  0x72 PF: > { %p2765_p12 = scmp.ne.s32.totalorder %s2762_s15, 0 }
  0x73   : > { %s2517_s10 = sand.u32 (!%p2765_p12), 1, %s2286_s25   ;;  %p2766_p7 = scmp.ne.s32.totalorder (!%p2765_p12), %s2758_s12, 0 }
  0x74   : > { %289 = sbr.rel (%p2765_p12) target bundleno = 922 (0x39a), region = 48  ;;  %s292_s23 = scalar_lea.sflag (!%p2765_p12), [#allocation3], %s2517_s10 }
  0x75   : > { %s1857_s14 = smul.u32 (!%p2765_p12), 192, %s2517_s10 }
  0x77   : > { %s2521_s29 = scalar_lea.vmem (!%p2765_p12), [#allocation2], %s1857_s14 }
  0x7b   : > { %2269 = dma.done.wait (%p2766_p7), %s292_s23, 3072  }
  0x7c   : > { %2271 = vsyncadd (%p2766_p7), %s292_s23, 4294964224  ;;  %p2767_p2 = scmp.eq.s32.totalorder %s2367_s28, 0 }
  0x7e   : > { %2273 = dma.done.wait (%p2767_p2), [#allocation6], 16384   ;;  %p2768_p8 = pmov %p2767_p2 }
  0x7f   : > { %v1924_v0 = vld [vmem:[#allocation5 + $0x104] ss:$8 sps:$4 sm:$0xff]   ;;  %v1926_v1 = vld [vmem:[#allocation5 + $0x100] ss:$8 sps:$4 sm:$0xff]   ;;  %v1927_v2 = vld [vmem:[#allocation5 + $0x114] ss:$8 sps:$4 sm:$0xff]  }
  0x80   : > { %2275 = vsyncadd (%p2768_p8), [#allocation6], 4294950912  ;;  %1023 = vmatprep.subr.bf16.mxu0 %v1924_v0  ;;  %v1929_v3 = vld [vmem:[#allocation5 + $0x110] ss:$8 sps:$4 sm:$0xff]   ;;  %v1930_v4 = vld [vmem:[#allocation5 + $0x124] ss:$8 sps:$4 sm:$0xff]  }
  0x81   : > { %1024 = vmatpush1.bf16.msra.mxu0 %v1926_v1  ;;  %v1932_v5 = vld [vmem:[#allocation5 + $0x120] ss:$8 sps:$4 sm:$0xff]   ;;  %v1933_v6 = vld [vmem:[#allocation5 + $0x134] ss:$8 sps:$4 sm:$0xff]   ;;  %v1935_v7 = vld [vmem:[#allocation5 + $0x130] ss:$8 sps:$4 sm:$0xff]  }
  0x82   : > { %1025 = vmatprep.subr.bf16.mxu0 %v1927_v2  ;;  %v1936_v8 = vld [vmem:[#allocation5 + $0x144] ss:$8 sps:$4 sm:$0xff]   ;;  %v1938_v9 = vld [vmem:[#allocation5 + $0x140] ss:$8 sps:$4 sm:$0xff]   ;;  %v1939_v10 = vld [vmem:[#allocation5 + $0x154] ss:$8 sps:$4 sm:$0xff]  }
  0x83   : > { %v1941_v11 = vld [vmem:[#allocation5 + $0x150] ss:$8 sps:$4 sm:$0xff]   ;;  %v1942_v12 = vld [vmem:[#allocation5 + $0x164] ss:$8 sps:$4 sm:$0xff]   ;;  %v1971_v14 = vld [vmem:[#allocation5] ss:$8 sps:$4 sm:$0xff]  }
  0x84   : > { %v1969_v13 = vld [vmem:[#allocation5 + $0x4] ss:$8 sps:$4 sm:$0xff]   ;;  %v1944_v15 = vld [vmem:[#allocation5 + $0x160] ss:$8 sps:$4 sm:$0xff]   ;;  %v1945_v16 = vld [vmem:[#allocation5 + $0x174] ss:$8 sps:$4 sm:$0xff]  }
  0x85   : > { %1026 = vmatpush1.bf16.msra.mxu0 %v1929_v3  ;;  %970 = vmatprep.subr.bf16.mxu1 %v1969_v13  ;;  %v1975_v17 = vld [vmem:[#allocation5 + $0x14] ss:$8 sps:$4 sm:$0xff]   ;;  %v1977_v18 = vld [vmem:[#allocation5 + $0x10] ss:$8 sps:$4 sm:$0xff]   ;;  %v355_v20 = vld [vmem:[%s2521_s29 + $0x48] sm:$0xff]  ;;  %s1688_s22 = sshll.u32 %s2517_s10, 6 }
  0x86   : > { %1027 = vmatprep.subr.bf16.mxu0 %v1930_v4  ;;  %971 = vmatpush1.bf16.msra.mxu1 %v1971_v14  ;;  %v349_v19 = vld [vmem:[%s2521_s29 + $0x18] sm:$0xff]  ;;  %v1981_v23 = vld [vmem:[#allocation5 + $0x24] ss:$8 sps:$4 sm:$0xff]   ;;  %v1983_v24 = vld [vmem:[#allocation5 + $0x20] ss:$8 sps:$4 sm:$0xff]   ;;  %s2666_s11 = scalar_lea.vmem [#allocation8], %s1688_s22 }
  0x87   : > { %972 = vmatprep.subr.bf16.mxu1 %v1975_v17  ;;  %v373_v21 = vpack.c.bf16 %v355_v20, %v349_v19  ;;  %v1947_v22 = vld [vmem:[#allocation5 + $0x170] ss:$8 sps:$4 sm:$0xff]   ;;  %v1948_v25 = vld [vmem:[#allocation5 + $0x184] ss:$8 sps:$4 sm:$0xff]   ;;  %v1950_v26 = vld [vmem:[#allocation5 + $0x180] ss:$8 sps:$4 sm:$0xff]  }
  0x88   : > { %v1987_v27 = vld [vmem:[#allocation5 + $0x34] ss:$8 sps:$4 sm:$0xff]   ;;  %v1989_v29 = vld [vmem:[#allocation5 + $0x30] ss:$8 sps:$4 sm:$0xff]   ;;  %v1993_v30 = vld [vmem:[#allocation5 + $0x44] ss:$8 sps:$4 sm:$0xff]  }
  0x89   : > { %1028 = vmatpush1.bf16.msra.mxu0 %v1932_v5  ;;  %1055 = vmatprep.mubr.bf16.mxu0 %v373_v21  ;;  %v1951_v28 = vld [vmem:[#allocation5 + $0x194] ss:$8 sps:$4 sm:$0xff]   ;;  %v1953_v31 = vld [vmem:[#allocation5 + $0x190] ss:$8 sps:$4 sm:$0xff]   ;;  %v1954_v32 = vld [vmem:[#allocation5 + $0x1a4] ss:$8 sps:$4 sm:$0xff]  }
  0x8a   : > { %1029 = vmatprep.subr.bf16.mxu0 %v1933_v6  ;;  %973 = vmatpush1.bf16.msra.mxu1 %v1977_v18  ;;  %v1995_v33 = vld [vmem:[#allocation5 + $0x40] ss:$8 sps:$4 sm:$0xff]   ;;  %v1999_v34 = vld [vmem:[#allocation5 + $0x54] ss:$8 sps:$4 sm:$0xff]   ;;  %v2001_v37 = vld [vmem:[#allocation5 + $0x50] ss:$8 sps:$4 sm:$0xff]  }
  0x8b   : > { %974 = vmatprep.subr.bf16.mxu1 %v1981_v23  ;;  %v1956_v35 = vld [vmem:[#allocation5 + $0x1a0] ss:$8 sps:$4 sm:$0xff]   ;;  %v1957_v36 = vld [vmem:[#allocation5 + $0x1b4] ss:$8 sps:$4 sm:$0xff]   ;;  %v2005_v38 = vld [vmem:[#allocation5 + $0x64] ss:$8 sps:$4 sm:$0xff]  }
  0x8c   : > { %v1959_v39 = vld [vmem:[#allocation5 + $0x1b0] ss:$8 sps:$4 sm:$0xff]   ;;  %v1960_v40 = vld [vmem:[#allocation5 + $0x1c4] ss:$8 sps:$4 sm:$0xff]   ;;  %v2007_v41 = vld [vmem:[#allocation5 + $0x60] ss:$8 sps:$4 sm:$0xff]  }
  0x8d   : > { %1030 = vmatpush1.bf16.msra.mxu0 %v1935_v7  ;;  %v2011_v42 = vld [vmem:[#allocation5 + $0x74] ss:$8 sps:$4 sm:$0xff]   ;;  %v1962_v43 = vld [vmem:[#allocation5 + $0x1c0] ss:$8 sps:$4 sm:$0xff]   ;;  %v2013_v45 = vld [vmem:[#allocation5 + $0x70] ss:$8 sps:$4 sm:$0xff]  }
  0x8e   : > { %1031 = vmatprep.subr.bf16.mxu0 %v1936_v8  ;;  %975 = vmatpush1.bf16.msra.mxu1 %v1983_v24  ;;  %v1963_v44 = vld [vmem:[#allocation5 + $0x1d4] ss:$8 sps:$4 sm:$0xff]   ;;  %v2017_v46 = vld [vmem:[#allocation5 + $0x84] ss:$8 sps:$4 sm:$0xff]   ;;  %v1965_v47 = vld [vmem:[#allocation5 + $0x1d0] ss:$8 sps:$4 sm:$0xff]  }
  0x8f   : > { %976 = vmatprep.subr.bf16.mxu1 %v1987_v27  ;;  %v1966_v48 = vld [vmem:[#allocation5 + $0x1e4] ss:$8 sps:$4 sm:$0xff]   ;;  %v2019_v49 = vld [vmem:[#allocation5 + $0x80] ss:$8 sps:$4 sm:$0xff]   ;;  %v2023_v50 = vld [vmem:[#allocation5 + $0x94] ss:$8 sps:$4 sm:$0xff]  }
  0x90   : > { %v1968_v51 = vld [vmem:[#allocation5 + $0x1e0] ss:$8 sps:$4 sm:$0xff]   ;;  %v1972_v52 = vld [vmem:[#allocation5 + $0x1f4] ss:$8 sps:$4 sm:$0xff]   ;;  %v2025_v53 = vld [vmem:[#allocation5 + $0x90] ss:$8 sps:$4 sm:$0xff]  }
  0x91   : > { %1032 = vmatpush1.bf16.msra.mxu0 %v1938_v9  ;;  %v2029_v54 = vld [vmem:[#allocation5 + $0xa4] ss:$8 sps:$4 sm:$0xff]   ;;  %v1974_v55 = vld [vmem:[#allocation5 + $0x1f0] ss:$8 sps:$4 sm:$0xff]   ;;  %v2031_v59 = vld [vmem:[#allocation5 + $0xa0] ss:$8 sps:$4 sm:$0xff]  }
  0x92   : > { %1033 = vmatprep.subr.bf16.mxu0 %v1939_v10  ;;  %977 = vmatpush1.bf16.msra.mxu1 %v1989_v29  ;;  %v1980_v56 = vld [vmem:[#allocation5 + $0x204] ss:$8 sps:$4 sm:$0xff]   ;;  %v348_v57 = vld [vmem:[%s2521_s29 + $0x10] sm:$0xff]  ;;  %v361_v62 = vld [vmem:[%s2521_s29 + $0x78] sm:$0xff]  ;;  %s1560_s16 = scalar_lea.sflag [#allocation4], %s2517_s10  ;;  %p2769_p9 = scmp.ne.s32.totalorder %s2759_s13, 0 }
  0x93   : > { %978 = vmatprep.subr.bf16.mxu1 %v1993_v30  ;;  %v354_v58 = vld [vmem:[%s2521_s29 + $0x40] sm:$0xff]  ;;  %v2035_v60 = vld [vmem:[#allocation5 + $0xb4] ss:$8 sps:$4 sm:$0xff]   ;;  %v367_v63 = vld [vmem:[%s2521_s29 + $0xa8] sm:$0xff]  ;;  %s1818_s19 = sshll.u32 (%p2769_p9), %s2367_s28, 2 }
  0x94   : > { %v372_v61 = vpack.c.bf16 %v354_v58, %v348_v57  ;;  %v1978_v0 = vld [vmem:[#allocation5 + $0x200] ss:$8 sps:$4 sm:$0xff]   ;;  %v1986_v1 = vld [vmem:[#allocation5 + $0x214] ss:$8 sps:$4 sm:$0xff]   ;;  %v2037_v2 = vld [vmem:[#allocation5 + $0xb0] ss:$8 sps:$4 sm:$0xff]   ;;  %v379_v4 = vpack.c.bf16 %v367_v63, %v361_v62 }
  0x95   : > { %1034 = vmatpush1.bf16.msra.mxu0 %v1941_v11  ;;  %v2041_v3 = vld [vmem:[#allocation5 + $0xc4] ss:$8 sps:$4 sm:$0xff]   ;;  %v353_v6 = vld [vmem:[%s2521_s29 + $0x38] sm:$0xff]  ;;  %v2043_v8 = vld [vmem:[#allocation5 + $0xc0] ss:$8 sps:$4 sm:$0xff]   ;;  %s1568_s30 = ssub.s32 (%p2769_p9), 7, %s1818_s19 }
  0x96   : > { %1035 = vmatprep.subr.bf16.mxu0 %v1942_v12  ;;  %979 = vmatpush1.bf16.msra.mxu1 %v1995_v33  ;;  %v347_v5 = vld [vmem:[%s2521_s29 + $0x8] sm:$0xff]  ;;  %v1984_v7 = vld [vmem:[#allocation5 + $0x210] ss:$8 sps:$4 sm:$0xff]   ;;  %v366_v11 = vld [vmem:[%s2521_s29 + $0xa0] sm:$0xff]  ;;  %p1569_p10 = scmp.lt.s32.totalorder (%p2769_p9), %s1568_s30, 4 }
  0x97   : > { %980 = vmatprep.subr.bf16.mxu1 %v1999_v34  ;;  %v371_v9 = vpack.c.bf16 %v353_v6, %v347_v5  ;;  %v360_v10 = vld [vmem:[%s2521_s29 + $0x70] sm:$0xff]  ;;  %v1992_v12 = vld [vmem:[#allocation5 + $0x224] ss:$8 sps:$4 sm:$0xff]   ;;  %v1990_v17 = vld [vmem:[#allocation5 + $0x220] ss:$8 sps:$4 sm:$0xff]  }
  0x98   : > { %v2047_v13 = vld [vmem:[#allocation5 + $0xd4] ss:$8 sps:$4 sm:$0xff]   ;;  %v378_v14 = vpack.c.bf16 %v366_v11, %v360_v10  ;;  %v2049_v19 = vld [vmem:[#allocation5 + $0xd0] ss:$8 sps:$4 sm:$0xff]   ;;  %v2053_v20 = vld [vmem:[#allocation5 + $0xe4] ss:$8 sps:$4 sm:$0xff]  }
  0x99   : > { %1036 = vmatpush1.bf16.msra.mxu0 %v1944_v15  ;;  %1002 = vmatprep.mubr.bf16.mxu1 %v371_v9  ;;  %v351_v15 = vld [vmem:[%s2521_s29 + $0x28] sm:$0xff]  ;;  %v1998_v18 = vld [vmem:[#allocation5 + $0x234] ss:$8 sps:$4 sm:$0xff]   ;;  %v2061_v27 = vld [vmem:[#allocation5 + $0xf0] ss:$8 sps:$4 sm:$0xff]  }
  0x9a   : > { %1037 = vmatprep.subr.bf16.mxu0 %v1945_v16  ;;  %981 = vmatpush1.bf16.msra.mxu1 %v2001_v37  ;;  %v357_v16 = vld [vmem:[%s2521_s29 + $0x58] sm:$0xff]  ;;  %v2004_v23 = vld [vmem:[#allocation5 + $0x244] ss:$8 sps:$4 sm:$0xff]   ;;  %v2055_v24 = vld [vmem:[#allocation5 + $0xe0] ss:$8 sps:$4 sm:$0xff]  }
  0x9b   : > { %982 = vmatprep.subr.bf16.mxu1 %v2005_v38  ;;  %v375_v21 = vpack.c.bf16 %v357_v16, %v351_v15  ;;  %v346_v29 = vld [vmem:[%s2521_s29] sm:$0xff]  ;;  %v352_v30 = vld [vmem:[%s2521_s29 + $0x30] sm:$0xff]  ;;  %v363_v15 = vld [vmem:[%s2521_s29 + $0x88] sm:$0xff] }
  0x9c   : > { %v2070_v33 = vld [vmem:[#allocation7 + $0x4] ss:$8 sps:$4 sm:$0xff]   ;;  %v2008_v34 = vld [vmem:[#allocation5 + $0x250] ss:$8 sps:$4 sm:$0xff]   ;;  %v2068_v38 = vld [vmem:[#allocation7] ss:$8 sps:$4 sm:$0xff]  }
  0x9d   : > { %1038 = vmatpush1.bf16.msra.mxu0 %v1947_v22  ;;  %v1996_v22 = vld [vmem:[#allocation5 + $0x230] ss:$8 sps:$4 sm:$0xff]   ;;  %v2080_v57 = vld [vmem:[#allocation7 + $0x40] ss:$8 sps:$4 sm:$0xff]   ;;  %v2085_v58 = vld [vmem:[#allocation7 + $0x54] ss:$8 sps:$4 sm:$0xff]  }
  0x9e   : > { %1039 = vmatprep.subr.bf16.mxu0 %v1948_v25  ;;  %983 = vmatpush1.bf16.msra.mxu1 %v2007_v41  ;;  %v2059_v25 = vld [vmem:[#allocation5 + $0xf4] ss:$8 sps:$4 sm:$0xff]   ;;  %v358_v41 = vld [vmem:[%s2521_s29 + $0x60] sm:$0xff]  ;;  %v2044_v63 = vld [vmem:[#allocation5 + $0x2b0] ss:$8 sps:$4 sm:$0xff]  }
  0x9f   : > { %984 = vmatprep.subr.bf16.mxu1 %v2011_v42  ;;  %v364_v42 = vld [vmem:[%s2521_s29 + $0x90] sm:$0xff]  ;;  %v2088_v62 = vld [vmem:[#allocation7 + $0x64] ss:$8 sps:$4 sm:$0xff]   ;;  %v2092_v9 = vld [vmem:[#allocation7 + $0x80] ss:$8 sps:$4 sm:$0xff]  }
  0xa0   : > { %v2089_v5 = vld [vmem:[#allocation7 + $0x70] ss:$8 sps:$4 sm:$0xff]   ;;  %v2094_v6 = vld [vmem:[#allocation7 + $0x84] ss:$8 sps:$4 sm:$0xff]   ;;  %v2062_v10 = vld [vmem:[#allocation5 + $0x2e0] ss:$8 sps:$4 sm:$0xff]  }
  0xa1   : > { %1040 = vmatpush1.bf16.msra.mxu0 %v1950_v26  ;;  %v2002_v26 = vld [vmem:[#allocation5 + $0x240] ss:$8 sps:$4 sm:$0xff]   ;;  %v2067_v11 = vld [vmem:[#allocation5 + $0x2f4] ss:$8 sps:$4 sm:$0xff]  }
  0xa2   : > { %1041 = vmatprep.subr.bf16.mxu0 %v1951_v28  ;;  %985 = vmatpush1.bf16.msra.mxu1 %v2013_v45  ;;  %v2010_v28 = vld [vmem:[#allocation5 + $0x254] ss:$8 sps:$4 sm:$0xff]   ;;  %v2076_v45 = vld [vmem:[#allocation7 + $0x24] ss:$8 sps:$4 sm:$0xff]  }
  0xa3   : > { %986 = vmatprep.subr.bf16.mxu1 %v2017_v46  ;;  %v376_v46 = vpack.c.bf16 %v364_v42, %v358_v41  ;;  %v369_v16 = vld [vmem:[%s2521_s29 + $0xb8] sm:$0xff] }
  0xa5   : > { %1042 = vmatpush1.bf16.msra.mxu0 %v1953_v31  ;;  %v359_v31 = vld [vmem:[%s2521_s29 + $0x68] sm:$0xff] }
  0xa6   : > { %1043 = vmatprep.subr.bf16.mxu0 %v1954_v32  ;;  %987 = vmatpush1.bf16.msra.mxu1 %v2019_v49  ;;  %v365_v32 = vld [vmem:[%s2521_s29 + $0x98] sm:$0xff]  ;;  %v2074_v49 = vld [vmem:[#allocation7 + $0x20] ss:$8 sps:$4 sm:$0xff]  }
  0xa7   : > { %988 = vmatprep.subr.bf16.mxu1 %v2023_v50  ;;  %v377_v37 = vpack.c.bf16 %v365_v32, %v359_v31  ;;  %v2079_v50 = vld [vmem:[#allocation7 + $0x34] ss:$8 sps:$4 sm:$0xff]   ;;  %v2107_v31 = vld [vmem:[#allocation7 + $0xd0] ss:$8 sps:$4 sm:$0xff]   ;;  %v2112_v32 = vld [vmem:[#allocation7 + $0xe4] ss:$8 sps:$4 sm:$0xff]  }
  0xa9   : > { %1044 = vmatpush1.bf16.msra.mxu0 %v1956_v35  ;;  %v370_v35 = vpack.c.bf16 %v352_v30, %v346_v29  ;;  %v2104_v29 = vld [vmem:[#allocation7 + $0xc0] ss:$8 sps:$4 sm:$0xff]   ;;  %v2109_v30 = vld [vmem:[#allocation7 + $0xd4] ss:$8 sps:$4 sm:$0xff]  }
  0xaa   : > { %1045 = vmatprep.subr.bf16.mxu0 %v1957_v36  ;;  %989 = vmatpush1.bf16.msra.mxu1 %v2025_v53  ;;  %v2016_v36 = vld [vmem:[#allocation5 + $0x264] ss:$8 sps:$4 sm:$0xff]   ;;  %v2077_v53 = vld [vmem:[#allocation7 + $0x30] ss:$8 sps:$4 sm:$0xff]  }
  0xab   : > { %990 = vmatprep.subr.bf16.mxu1 %v2029_v54  ;;  %v2082_v54 = vld [vmem:[#allocation7 + $0x44] ss:$8 sps:$4 sm:$0xff]  }
  0xad   : > { %1046 = vmatpush1.bf16.msra.mxu0 %v1959_v39  ;;  %v2073_v39 = vld [vmem:[#allocation7 + $0x14] ss:$8 sps:$4 sm:$0xff]  }
  0xae   : > { %1047 = vmatprep.subr.bf16.mxu0 %v1960_v40  ;;  %991 = vmatpush1.bf16.msra.mxu1 %v2031_v59  ;;  %v2014_v40 = vld [vmem:[#allocation5 + $0x260] ss:$8 sps:$4 sm:$0xff]  }
  0xaf   : > { %992 = vmatprep.subr.bf16.mxu1 %v2035_v60  ;;  %v2038_v59 = vld [vmem:[#allocation5 + $0x2a0] ss:$8 sps:$4 sm:$0xff]   ;;  %v2046_v60 = vld [vmem:[#allocation5 + $0x2b4] ss:$8 sps:$4 sm:$0xff]  }
  0xb1   : > { %1048 = vmatpush1.bf16.msra.mxu0 %v1962_v43  ;;  %v2022_v43 = vld [vmem:[#allocation5 + $0x274] ss:$8 sps:$4 sm:$0xff]  }
  0xb2   : > { %1049 = vmatprep.subr.bf16.mxu0 %v1963_v44  ;;  %993 = vmatpush1.bf16.msra.mxu1 %v2037_v2  ;;  %v2071_v44 = vld [vmem:[#allocation7 + $0x10] ss:$8 sps:$4 sm:$0xff]   ;;  %v2091_v2 = vld [vmem:[#allocation7 + $0x74] ss:$8 sps:$4 sm:$0xff]  }
  0xb3   : > { %994 = vmatprep.subr.bf16.mxu1 %v2041_v3  ;;  %v2050_v3 = vld [vmem:[#allocation5 + $0x2c0] ss:$8 sps:$4 sm:$0xff]  }
  0xb5   : > { %1050 = vmatpush1.bf16.msra.mxu0 %v1965_v47  ;;  %v2020_v47 = vld [vmem:[#allocation5 + $0x270] ss:$8 sps:$4 sm:$0xff]  }
  0xb6   : > { %1051 = vmatprep.subr.bf16.mxu0 %v1966_v48  ;;  %995 = vmatpush1.bf16.msra.mxu1 %v2043_v8  ;;  %v2028_v48 = vld [vmem:[#allocation5 + $0x284] ss:$8 sps:$4 sm:$0xff]  }
  0xb7   : > { %996 = vmatprep.subr.bf16.mxu1 %v2047_v13  ;;  %v2064_v8 = vld [vmem:[#allocation5 + $0x2e4] ss:$8 sps:$4 sm:$0xff]  }
  0xb8   : > { %v350_v13 = vld [vmem:[%s2521_s29 + $0x20] sm:$0xff] }
  0xb9   : > { %1052 = vmatpush1.bf16.msra.mxu0 %v1968_v51  ;;  %v2026_v51 = vld [vmem:[#allocation5 + $0x280] ss:$8 sps:$4 sm:$0xff]  }
  0xba   : > { %1053 = vmatprep.subr.bf16.mxu0 %v1972_v52  ;;  %997 = vmatpush1.bf16.msra.mxu1 %v2049_v19  ;;  %v2034_v52 = vld [vmem:[#allocation5 + $0x294] ss:$8 sps:$4 sm:$0xff]   ;;  %v362_v19 = vld [vmem:[%s2521_s29 + $0x80] sm:$0xff] }
  0xbb   : > { %998 = vmatprep.subr.bf16.mxu1 %v2053_v20  ;;  %v368_v20 = vld [vmem:[%s2521_s29 + $0xb0] sm:$0xff] }
  0xbd   : > { %1054 = vmatpush1.bf16.msra.mxu0 %v1974_v55  ;;  %v2032_v55 = vld [vmem:[#allocation5 + $0x290] ss:$8 sps:$4 sm:$0xff]  }
  0xbe   : > { %1076 = vmatprep.subr.bf16.mxu0 %v1980_v56  ;;  %999 = vmatpush1.bf16.msra.mxu1 %v2055_v24  ;;  %v2040_v56 = vld [vmem:[#allocation5 + $0x2a4] ss:$8 sps:$4 sm:$0xff]  }
  0xbf   : > { %1000 = vmatprep.subr.bf16.mxu1 %v2059_v25  ;;  %v2100_v24 = vld [vmem:[#allocation7 + $0xa4] ss:$8 sps:$4 sm:$0xff]   ;;  %v2098_v25 = vld [vmem:[#allocation7 + $0xa0] ss:$8 sps:$4 sm:$0xff]  }
  0xc0   : > { %1056 = vmatmul.mubr.bf16.vlgmr.msra.gmra.mrb[0].mxu0 %v372_v61  ;;  %v2083_v61 = vld [vmem:[#allocation7 + $0x50] ss:$8 sps:$4 sm:$0xff]  }
  0xc1   : > { %1077 = vmatpush1.bf16.msra.mxu0 %v1978_v0  ;;  %1065 = vmatprep.mubr.bf16.mxu0 %v379_v4  ;;  %v2052_v0 = vld [vmem:[#allocation5 + $0x2c4] ss:$8 sps:$4 sm:$0xff]   ;;  %v2058_v4 = vld [vmem:[#allocation5 + $0x2d4] ss:$8 sps:$4 sm:$0xff]  }
  0xc2   : > { %1078 = vmatprep.subr.bf16.mxu0 %v1986_v1  ;;  %1001 = vmatpush1.bf16.msra.mxu1 %v2061_v27  ;;  %v2086_v1 = vld [vmem:[#allocation7 + $0x60] ss:$8 sps:$4 sm:$0xff]   ;;  %v2101_v27 = vld [vmem:[#allocation7 + $0xb0] ss:$8 sps:$4 sm:$0xff]  }
  0xc3   : > { %1377 = vmatprep.subr.bf16.mxu1 %v2070_v33  ;;  %v2110_v33 = vld [vmem:[#allocation7 + $0xe0] ss:$8 sps:$4 sm:$0xff]  }
  0xc5   : > { %1079 = vmatpush1.bf16.msra.mxu0 %v1984_v7  ;;  %1003 = vmatmul.mubr.bf16.vlgmr.msra.gmra.mrb[0].mxu1 %v370_v35  ;;  %v2056_v7 = vld [vmem:[#allocation5 + $0x2d0] ss:$8 sps:$4 sm:$0xff]  }
  0xc6   : > { %1080 = vmatprep.subr.bf16.mxu0 %v1992_v12  ;;  %1012 = vmatprep.mubr.bf16.mxu1 %v377_v37  ;;  %v2065_v12 = vld [vmem:[#allocation5 + $0x2f0] ss:$8 sps:$4 sm:$0xff]  }
  0xc7   : > { %1378 = vmatpush1.bf16.msra.mxu1 %v2068_v38  ;;  %v2113_v35 = vld [vmem:[#allocation7 + $0xf0] ss:$8 sps:$4 sm:$0xff]  }
  0xc8   : > { %1066 = vmatmul.mubr.bf16.gmra.mrb[4].mxu0 %v378_v14  ;;  %1379 = vmatprep.subr.bf16.mxu1 %v2073_v39  ;;  %v356_v14 = vld [vmem:[%s2521_s29 + $0x50] sm:$0xff] }
  0xc9   : > { %1081 = vmatpush1.bf16.msra.mxu0 %v1990_v17  ;;  %1108 = vmatprep.mubr.bf16.mxu0 %v375_v21  ;;  %v374_v17 = vpack.c.bf16 %v356_v14, %v350_v13  ;;  %v380_v21 = vpack.c.bf16 %v368_v20, %v362_v19 }
  0xca   : > { %1082 = vmatprep.subr.bf16.mxu0 %v1998_v18  ;;  %v381_v18 = vpack.c.bf16 %v369_v16, %v363_v15 }
  0xcb   : > { %1380 = vmatpush1.bf16.msra.mxu1 %v2071_v44  ;;  %v480_v44 = vlaneseq }
  0xcc   : > { %1381 = vmatprep.subr.bf16.mxu1 %v2076_v45 }
  0xcd   : > { %1083 = vmatpush1.bf16.msra.mxu0 %v1996_v22  ;;  %1013 = vmatmul.mubr.bf16.gmra.mrb[4].mxu1 %v376_v46  ;;  %v2095_v22 = vld [vmem:[#allocation7 + $0x90] ss:$8 sps:$4 sm:$0xff]   ;;  %v481_v45 = vshrl.u32 %v480_v44, 7 }
  0xce   : > { %1084 = vmatprep.subr.bf16.mxu0 %v2004_v23  ;;  %v2097_v23 = vld [vmem:[#allocation7 + $0x94] ss:$8 sps:$4 sm:$0xff]  }
  0xcf   : > { %1382 = vmatpush1.bf16.msra.mxu1 %v2074_v49  ;;  %v2555_v46 = vsub.s32 0, %v481_v45 }
  0xd0   : > { %1383 = vmatprep.subr.bf16.mxu1 %v2079_v50 }
  0xd1   : > { %1085 = vmatpush1.bf16.msra.mxu0 %v2002_v26  ;;  %v2103_v26 = vld [vmem:[#allocation7 + $0xb4] ss:$8 sps:$4 sm:$0xff]  }
  0xd2   : > { %1086 = vmatprep.subr.bf16.mxu0 %v2010_v28  ;;  %v2106_v28 = vld [vmem:[#allocation7 + $0xc4] ss:$8 sps:$4 sm:$0xff]  }
  0xd3   : > { %1384 = vmatpush1.bf16.msra.mxu1 %v2077_v53 }
  0xd4   : > { %1385 = vmatprep.subr.bf16.mxu1 %v2082_v54 }
  0xd5   : > { %1087 = vmatpush1.bf16.msra.mxu0 %v2008_v34  ;;  %v2115_v34 = vld [vmem:[#allocation7 + $0xf4] ss:$8 sps:$4 sm:$0xff]  }
  0xd6   : > { %1088 = vmatprep.subr.bf16.mxu0 %v2016_v36 }
  0xd7   : > { %1386 = vmatpush1.bf16.msra.mxu1 %v2080_v57 }
  0xd8   : > { %1387 = vmatprep.subr.bf16.mxu1 %v2085_v58 }
  0xd9   : > { %1089 = vmatpush1.bf16.msra.mxu0 %v2014_v40 }
  0xda   : > { %1090 = vmatprep.subr.bf16.mxu0 %v2022_v43 }
  0xdb   : > { %1388 = vmatpush1.bf16.msra.mxu1 %v2083_v61 }
  0xdc   : > { %1389 = vmatprep.subr.bf16.mxu1 %v2088_v62 }
  0xdd   : > { %1091 = vmatpush1.bf16.msra.mxu0 %v2020_v47  ;;  %v478_v47 = vld [vmem:[%s2743_s2] sm:$0x3] }
  0xde   : > { %1092 = vmatprep.subr.bf16.mxu0 %v2028_v48  ;;  %v2560_v48 = vsub.s32 1, %v481_v45  ;;  %v483_v49 = vrot.slane %v478_v47, %v2555_v46 }
  0xdf   : > { %1390 = vmatpush1.bf16.msra.mxu1 %v2086_v1 }
  0xe0   : > { %1391 = vmatprep.subr.bf16.mxu1 %v2091_v2  ;;  %v487_v50 = vrot.slane %v478_v47, %v2560_v48 }
  0xe1   : > { %1093 = vmatpush1.bf16.msra.mxu0 %v2026_v51 }
  0xe2   : > { %1094 = vmatprep.subr.bf16.mxu0 %v2034_v52 }
  0xe3   : > { %1392 = vmatpush1.bf16.msra.mxu1 %v2089_v5 }
  0xe4   : > { %1393 = vmatprep.subr.bf16.mxu1 %v2094_v6 }
  0xe5   : > { %1095 = vmatpush1.bf16.msra.mxu0 %v2032_v55 }
  0xe6   : > { %1096 = vmatprep.subr.bf16.mxu0 %v2040_v56 }
  0xe7   : > { %1394 = vmatpush1.bf16.msra.mxu1 %v2092_v9 }
  0xe8   : > { %1395 = vmatprep.subr.bf16.mxu1 %v2097_v23 }
  0xe9   : > { %1097 = vmatpush1.bf16.msra.mxu0 %v2038_v59 }
  0xea   : > { %1098 = vmatprep.subr.bf16.mxu0 %v2046_v60 }
  0xeb   : > { %1396 = vmatpush1.bf16.msra.mxu1 %v2095_v22 }
  0xec   : > { %1397 = vmatprep.subr.bf16.mxu1 %v2100_v24 }
  0xed   : > { %1099 = vmatpush1.bf16.msra.mxu0 %v2044_v63 }
  0xee   : > { %1100 = vmatprep.subr.bf16.mxu0 %v2052_v0 }
  0xef   : > { %1398 = vmatpush1.bf16.msra.mxu1 %v2098_v25 }
  0xf0   : > { %1399 = vmatprep.subr.bf16.mxu1 %v2103_v26 }
  0xf1   : > { %1101 = vmatpush1.bf16.msra.mxu0 %v2050_v3 }
  0xf2   : > { %1102 = vmatprep.subr.bf16.mxu0 %v2058_v4 }
  0xf3   : > { %1400 = vmatpush1.bf16.msra.mxu1 %v2101_v27 }
  0xf4   : > { %1401 = vmatprep.subr.bf16.mxu1 %v2106_v28 }
  0xf5   : > { %1103 = vmatpush1.bf16.msra.mxu0 %v2056_v7 }
  0xf6   : > { %1104 = vmatprep.subr.bf16.mxu0 %v2064_v8 }
  0xf7   : > { %1402 = vmatpush1.bf16.msra.mxu1 %v2104_v29 }
  0xf8   : > { %1403 = vmatprep.subr.bf16.mxu1 %v2109_v30 }
  0xf9   : > { %1105 = vmatpush1.bf16.msra.mxu0 %v2062_v10 }
  0xfa   : > { %1106 = vmatprep.subr.bf16.mxu0 %v2067_v11 }
  0xfb   : > { %1404 = vmatpush1.bf16.msra.mxu1 %v2107_v31 }
  0xfc   : > { %1405 = vmatprep.subr.bf16.mxu1 %v2112_v32 }
  0xfd   : > { %1107 = vmatpush1.bf16.msra.mxu0 %v2065_v12 }
  0xff   : > { %1406 = vmatpush1.bf16.msra.mxu1 %v2110_v33 }
 0x100   : > { %1109 = vmatmul.mubr.bf16.vlgmr.msra.gmra.mrb[0].mxu0 %v374_v17  ;;  %1407 = vmatprep.subr.bf16.mxu1 %v2115_v34 }
 0x101   : > { %1118 = vmatprep.mubr.bf16.mxu0 %v381_v18 }
 0x103   : > { %1408 = vmatpush1.bf16.msra.mxu1 %v2113_v35 }
 0x108   : > { %1119 = vmatmul.mubr.bf16.gmra.mrb[4].mxu0 %v380_v21 }
 0x198   : > { %v1004_v36 = vpop.f32.mrb[0].mxu1 }
 0x199   : > { %v1006_v37 = vpop.f32.mrb[1].mxu1  ;;  %v1005_v51 = vadd.f32 %v1004_v36, %v483_v49 }
 0x19a   : > { %v1008_v38 = vpop.f32.mrb[2].mxu1  ;;  %v1007_v52 = vadd.f32 %v1006_v37, %v487_v50 }
 0x19b   : > { %v1010_v39 = vpop.f32.mrb[3].mxu1  ;;  %v1009_v54 = vadd.f32 %v1008_v38, %v483_v49 }
 0x19c   : > { %v1011_v57 = vadd.f32 %v1010_v39, %v487_v50 }
 0x1a0   : > { %v1014_v40 = vpop.f32.mrb[4].mxu1 }
 0x1a1   : > { %v1016_v41 = vpop.f32.mrb[5].mxu1  ;;  %v1015_v2 = vadd.f32 %v1014_v40, %v483_v49 }
 0x1a2   : > { %v1018_v42 = vpop.f32.mrb[6].mxu1  ;;  %v1017_v4 = vadd.f32 %v1016_v41, %v487_v50 }
 0x1a3   : > { %v1020_v43 = vpop.f32.mrb[7].mxu1  ;;  %v1019_v6 = vadd.f32 %v1018_v42, %v483_v49 }
 0x1a4   : > { %v1021_v9 = vadd.f32 %v1020_v43, %v487_v50 }
 0x1d3   : > { %v1110_v53 = vpop.f32.mrb[0].mxu0 }
 0x1d4   : > { %v2564_v55 = vadd.f32 %v1110_v53, %v1005_v51  ;;  %v1112_v56 = vpop.f32.mrb[1].mxu0 }
 0x1d5   : > { %v2566_v58 = vadd.f32 %v1112_v56, %v1007_v52  ;;  %v1114_v59 = vpop.f32.mrb[2].mxu0 }
 0x1d6   : > { %v1137_v60 = vmul.f32 0.70710677, %v2564_v55  ;;  %v2569_v61 = vadd.f32 %v1114_v59, %v1009_v54  ;;  %v1116_v62 = vpop.f32.mrb[3].mxu0  ;;  %v1129_v30 = vmul.f32 0.5, %v2564_v55  ;;  %v1205_v59 = vld [vmem:[%s2745_s4] sm:$0x3] }
 0x1d7   : > { %v1138_v63 = vmul.f32 0.70710677, %v2566_v58  ;;  %v2572_v0 = vadd.f32 %v1116_v62, %v1011_v57  ;;  %v1130_v27 = vmul.f32 0.5, %v2566_v58  ;;  %v1214_v62 = vrot.slane %v1205_v59, %v2560_v48 }
 0x1d8   : > { %2116 = verf.f32 %v1137_v60  ;;  %v1139_v1 = vmul.f32 0.70710677, %v2569_v61  ;;  %v1131_v25 = vmul.f32 0.5, %v2569_v61  ;;  %v1210_v60 = vrot.slane %v1205_v59, %v2555_v46 }
 0x1d9   : > { %2118 = verf.f32 %v1138_v63  ;;  %v1140_v3 = vmul.f32 0.70710677, %v2572_v0  ;;  %v1132_v28 = vmul.f32 0.5, %v2572_v0 }
 0x1da   : > { %2120 = verf.f32 %v1139_v1 }
 0x1db   : > { %2122 = verf.f32 %v1140_v3  ;;  %v1120_v5 = vpop.f32.mrb[4].mxu0 }
 0x1dc   : > { %v2576_v7 = vadd.f32 %v1120_v5, %v1015_v2  ;;  %v1122_v8 = vpop.f32.mrb[5].mxu0 }
 0x1dd   : > { %v2578_v10 = vadd.f32 %v1122_v8, %v1017_v4  ;;  %v1124_v11 = vpop.f32.mrb[6].mxu0 }
 0x1de   : > { %v1141_v12 = vmul.f32 0.70710677, %v2576_v7  ;;  %v2581_v13 = vadd.f32 %v1124_v11, %v1019_v6  ;;  %v1126_v14 = vpop.f32.mrb[7].mxu0  ;;  %v1133_v50 = vmul.f32 0.5, %v2576_v7 }
 0x1df   : > { %v1142_v15 = vmul.f32 0.70710677, %v2578_v10  ;;  %v2584_v16 = vadd.f32 %v1126_v14, %v1021_v9  ;;  %v1134_v45 = vmul.f32 0.5, %v2578_v10 }
 0x1e0   : > { %2124 = verf.f32 %v1141_v12  ;;  %v1143_v17 = vmul.f32 0.70710677, %v2581_v13  ;;  %v1135_v42 = vmul.f32 0.5, %v2581_v13 }
 0x1e1   : > { %2126 = verf.f32 %v1142_v15  ;;  %v1144_v18 = vmul.f32 0.70710677, %v2584_v16  ;;  %v1136_v47 = vmul.f32 0.5, %v2584_v16 }
 0x1e2   : > { %v2117_v19 = vpop.eup %2116  ;;  %2128 = verf.f32 %v1143_v17 }
 0x1e3   : > { %v2119_v20 = vpop.eup %2118  ;;  %2130 = verf.f32 %v1144_v18  ;;  %v1153_v24 = vadd.f32 1.0, %v2117_v19 }
 0x1e4   : > { %v2121_v21 = vpop.eup %2120  ;;  %v1154_v22 = vadd.f32 1.0, %v2119_v20 }
 0x1e5   : > { %v2123_v23 = vpop.eup %2122  ;;  %v1155_v26 = vadd.f32 1.0, %v2121_v21  ;;  %v1161_v34 = vmul.f32 %v1153_v24, %v1129_v30 }
 0x1e6   : > { %v1156_v29 = vadd.f32 1.0, %v2123_v23  ;;  %v1162_v32 = vmul.f32 %v1154_v22, %v1130_v27 }
 0x1e7   : > { %v1163_v31 = vmul.f32 %v1155_v26, %v1131_v25 }
 0x1e8   : > { %v1164_v33 = vmul.f32 %v1156_v29, %v1132_v28 }
 0x1e9   : > { %v1169_v38 = vpack.c.bf16 %v1163_v31, %v1161_v34 }
 0x1ea   : > { %v2125_v35 = vpop.eup %2124  ;;  %v1170_v36 = vpack.c.bf16 %v1164_v33, %v1162_v32 }
 0x1eb   : > { %v2127_v37 = vpop.eup %2126  ;;  %v1157_v43 = vadd.f32 1.0, %v2125_v35 }
 0x1ec   : > { %v2129_v39 = vpop.eup %2128  ;;  %1409 = vmatprep.mubr.bf16.mxu1 %v1170_v36  ;;  %v1158_v40 = vadd.f32 1.0, %v2127_v37 }
 0x1ed   : > { %v2131_v41 = vpop.eup %2130  ;;  %1410 = vmatmul.mubr.bf16.vlgmr.msra.gmra.mrb[8].mxu1 %v1169_v38  ;;  %v1159_v44 = vadd.f32 1.0, %v2129_v39  ;;  %v1165_v54 = vmul.f32 %v1157_v43, %v1133_v50 }
 0x1ee   : > { %v1160_v49 = vadd.f32 1.0, %v2131_v41  ;;  %v1166_v52 = vmul.f32 %v1158_v40, %v1134_v45 }
 0x1ef   : > { %v1167_v51 = vmul.f32 %v1159_v44, %v1135_v42 }
 0x1f0   : > { %v1168_v53 = vmul.f32 %v1160_v49, %v1136_v47 }
 0x1f1   : > { %v1171_v57 = vpack.c.bf16 %v1167_v51, %v1165_v54 }
 0x1f2   : > { %v1172_v56 = vpack.c.bf16 %v1168_v53, %v1166_v52 }
 0x1f4   : > { %1419 = vmatprep.mubr.bf16.mxu1 %v1172_v56 }
 0x1f5   : > { %1420 = vmatmul.mubr.bf16.gmra.mrb[12].mxu1 %v1171_v57 }
 0x2c0   : > { %v1411_v63 = vpop.f32.mrb[8].mxu1 }
 0x2c1   : > { %v1412_v1 = vadd.f32 %v1411_v63, %v1210_v60  ;;  %v1413_v2 = vpop.f32.mrb[9].mxu1 }
 0x2c2   : > { %v1414_v3 = vadd.f32 %v1413_v2, %v1214_v62  ;;  %v1415_v4 = vpop.f32.mrb[10].mxu1 }
 0x2c3   : > { %v2602_v5 = vadd.f32 %v2564_v55, %v1412_v1  ;;  %v1416_v6 = vadd.f32 %v1415_v4, %v1210_v60  ;;  %v1417_v8 = vpop.f32.mrb[11].mxu1  ;;  %v1503_v1 = vld [vmem:[%s2746_s5] sm:$0x3] }
 0x2c4   : > { %v2605_v9 = vadd.f32 %v2566_v58, %v1414_v3  ;;  %v1418_v11 = vadd.f32 %v1417_v8, %v1214_v62  ;;  %v1508_v8 = vrot.slane %v1503_v1, %v2555_v46 }
 0x2c5   : > { %v2608_v12 = vadd.f32 %v2569_v61, %v1416_v6  ;;  %v1455_v61 = vmul.f32 %v2602_v5, %v2602_v5 }
 0x2c6   : > { %v2611_v14 = vadd.f32 %v2572_v0, %v1418_v11  ;;  %v1438_v15 = vadd.f32 %v2605_v9, %v2602_v5  ;;  %v1456_v0 = vmul.f32 %v2605_v9, %v2605_v9  ;;  %v1512_v11 = vrot.slane %v1503_v1, %v2560_v48 }
 0x2c7   : > { %v1457_v17 = vmul.f32 %v2608_v12, %v2608_v12 }
 0x2c8   : > { %v1421_v55 = vpop.f32.mrb[12].mxu1  ;;  %1439 = vadd.xlane.f32.xlu0 %v1438_v15  ;;  %v1458_v18 = vmul.f32 %v2611_v14, %v2611_v14  ;;  %v1441_v23 = vadd.f32 %v2611_v14, %v2608_v12  ;;  %v1463_v30 = vadd.f32 %v1456_v0, %v1455_v61  ;;  %v1531_v15 = vld [vmem:[%s2747_s6] sm:$0x3] }
 0x2c9   : > { %v1422_v58 = vadd.f32 %v1421_v55, %v1210_v60  ;;  %v1423_v19 = vpop.f32.mrb[13].mxu1 }
 0x2ca   : > { %v1424_v20 = vadd.f32 %v1423_v19, %v1214_v62  ;;  %v1425_v21 = vpop.f32.mrb[14].mxu1  ;;  %v1466_v22 = vadd.f32 %v1458_v18, %v1457_v17  ;;  %v1536_v18 = vrot.slane %v1531_v15, %v2555_v46 }
 0x2cb   : > { %v2626_v24 = vadd.f32 %v2576_v7, %v1422_v58  ;;  %v1426_v25 = vadd.f32 %v1425_v21, %v1210_v60  ;;  %v1427_v26 = vpop.f32.mrb[15].mxu1  ;;  %v1540_v58 = vrot.slane %v1531_v15, %v2560_v48 }
 0x2cc   : > { %v2629_v27 = vadd.f32 %v2578_v10, %v1424_v20  ;;  %v1428_v28 = vadd.f32 %v1427_v26, %v1214_v62  ;;  %1467 = vadd.xlane.f32.xlu1 %v1466_v22  ;;  %1442 = vadd.xlane.f32.xlu0 %v1441_v23 }
 0x2cd   : > { %v2632_v29 = vadd.f32 %v2581_v13, %v1426_v25  ;;  %v1459_v7 = vmul.f32 %v2626_v24, %v2626_v24 }
 0x2ce   : > { %v2635_v31 = vadd.f32 %v2584_v16, %v1428_v28  ;;  %v1444_v32 = vadd.f32 %v2629_v27, %v2626_v24  ;;  %v1460_v10 = vmul.f32 %v2629_v27, %v2629_v27 }
 0x2cf   : > { %v1461_v34 = vmul.f32 %v2632_v29, %v2632_v29 }
 0x2d0   : > { %1445 = vadd.xlane.f32.xlu1 %v1444_v32  ;;  %1464 = vadd.xlane.f32.xlu0 %v1463_v30  ;;  %v1447_v33 = vadd.f32 %v2635_v31, %v2632_v29  ;;  %v1469_v13 = vadd.f32 %v1460_v10, %v1459_v7  ;;  %v1462_v16 = vmul.f32 %v2635_v31, %v2635_v31 }
 0x2d2   : > { %v1472_v35 = vadd.f32 %v1462_v16, %v1461_v34 }
 0x2d4   : > { %1448 = vadd.xlane.f32.xlu1 %v1447_v33  ;;  %1470 = vadd.xlane.f32.xlu0 %v1469_v13 }
 0x2d8   : > { %1473 = vadd.xlane.f32.xlu1 %v1472_v35 }
 0x355   : > { %v1440_v36 = vpop.xlane.xlu0 %1439 }
 0x356   : > { %v1451_v39 = vmul.f32 0.00390625, %v1440_v36 }
 0x358   : > { %v1479_v49 = vmul.f32 %v1451_v39, %v1451_v39  ;;  %v1495_v22 = vsub.f32 %v2602_v5, %v1451_v39  ;;  %v1496_v23 = vsub.f32 %v2605_v9, %v1451_v39 }
 0x359   : > { %v1468_v37 = vpop.xlane.xlu1 %1467  ;;  %v1443_v38 = vpop.xlane.xlu0 %1442 }
 0x35a   : > { %v1452_v40 = vmul.f32 0.00390625, %v1443_v38  ;;  %v1476_v41 = vmul.f32 0.00390625, %v1468_v37 }
 0x35c   : > { %v1480_v42 = vmul.f32 %v1452_v40, %v1452_v40  ;;  %v1497_v19 = vsub.f32 %v2608_v12, %v1452_v40  ;;  %v1498_v61 = vsub.f32 %v2611_v14, %v1452_v40 }
 0x35d   : > { %v1446_v43 = vpop.xlane.xlu1 %1445  ;;  %v1465_v44 = vpop.xlane.xlu0 %1464 }
 0x35e   : > { %v1484_v45 = vsub.f32 %v1476_v41, %v1480_v42  ;;  %v1453_v47 = vmul.f32 0.00390625, %v1446_v43  ;;  %v1475_v50 = vmul.f32 0.00390625, %v1465_v44 }
 0x360   : > { %v1488_v51 = vadd.f32 1e-05, %v1484_v45  ;;  %v1483_v52 = vsub.f32 %v1475_v50, %v1479_v49  ;;  %v1481_v54 = vmul.f32 %v1453_v47, %v1453_v47  ;;  %v1499_v12 = vsub.f32 %v2626_v24, %v1453_v47 }
 0x361   : > { %v1449_v53 = vpop.xlane.xlu1 %1448  ;;  %v1471_v56 = vpop.xlane.xlu0 %1470  ;;  %v1500_v14 = vsub.f32 %v2629_v27, %v1453_v47 }
 0x362   : > { %2132 = vrsqrt.f32 %v1488_v51  ;;  %v1487_v57 = vadd.f32 1e-05, %v1483_v52  ;;  %v1454_v59 = vmul.f32 0.00390625, %v1449_v53  ;;  %v1477_v60 = vmul.f32 0.00390625, %v1471_v56 }
 0x364   : > { %2134 = vrsqrt.f32 %v1487_v57  ;;  %v1485_v62 = vsub.f32 %v1477_v60, %v1481_v54  ;;  %v1482_v3 = vmul.f32 %v1454_v59, %v1454_v59  ;;  %v1501_v16 = vsub.f32 %v2632_v29, %v1454_v59 }
 0x365   : > { %v1474_v63 = vpop.xlane.xlu1 %1473  ;;  %v1502_v35 = vsub.f32 %v2635_v31, %v1454_v59 }
 0x366   : > { %v1489_v2 = vadd.f32 1e-05, %v1485_v62  ;;  %v1478_v4 = vmul.f32 0.00390625, %v1474_v63 }
 0x368   : > { %2136 = vrsqrt.f32 %v1489_v2  ;;  %v1486_v6 = vsub.f32 %v1478_v4, %v1482_v3 }
 0x36a   : > { %v1490_v17 = vadd.f32 1e-05, %v1486_v6 }
 0x36c   : > { %v2133_v55 = vpop.eup %2132  ;;  %2138 = vrsqrt.f32 %v1490_v17 }
 0x36d   : > { %v1517_v0 = vmul.f32 %v2133_v55, %v1508_v8  ;;  %v1518_v20 = vmul.f32 %v2133_v55, %v1512_v11 }
 0x36e   : > { %v2135_v21 = vpop.eup %2134 }
 0x36f   : > { %v1525_v25 = vmul.f32 %v1517_v0, %v1497_v19  ;;  %v1526_v26 = vmul.f32 %v1518_v20, %v1498_v61  ;;  %v1515_v28 = vmul.f32 %v2135_v21, %v1508_v8  ;;  %v1516_v30 = vmul.f32 %v2135_v21, %v1512_v11 }
 0x371   : > { %v1545_v46 = vadd.f32 %v1536_v18, %v1525_v25  ;;  %v1546_v32 = vadd.f32 %v1540_v58, %v1526_v26  ;;  %v1523_v48 = vmul.f32 %v1515_v28, %v1495_v22  ;;  %v1524_v7 = vmul.f32 %v1516_v30, %v1496_v23 }
 0x372   : > { %v2137_v10 = vpop.eup %2136 }
 0x373   : > { %1553 = vst [vmem:[%s2666_s11 + $0x10] sm:$0xff] %v1545_v46  ;;  %1554 = vst [vmem:[%s2666_s11 + $0x18] sm:$0xff] %v1546_v32  ;;  %v1543_v5 = vadd.f32 %v1536_v18, %v1523_v48  ;;  %v1544_v9 = vadd.f32 %v1540_v58, %v1524_v7  ;;  %v1519_v33 = vmul.f32 %v2137_v10, %v1508_v8 }
 0x374   : > { %v1520_v13 = vmul.f32 %v2137_v10, %v1512_v11 }
 0x375   : > { %1551 = vst [vmem:[%s2666_s11] sm:$0xff] %v1543_v5  ;;  %1552 = vst [vmem:[%s2666_s11 + $0x8] sm:$0xff] %v1544_v9  ;;  %v1527_v24 = vmul.f32 %v1519_v33, %v1499_v12 }
 0x376   : > { %v1528_v27 = vmul.f32 %v1520_v13, %v1500_v14  ;;  %v2139_v34 = vpop.eup %2138 }
 0x377   : > { %v1547_v36 = vadd.f32 %v1536_v18, %v1527_v24  ;;  %v1521_v38 = vmul.f32 %v2139_v34, %v1508_v8  ;;  %v1522_v39 = vmul.f32 %v2139_v34, %v1512_v11  ;;  %1566 = sbr.rel (!%p2769_p9) target bundleno = 922 (0x39a), region = 64 }
 0x378   : > { %v1548_v37 = vadd.f32 %v1540_v58, %v1528_v27 }
 0x379   : > { %1555 = vst [vmem:[%s2666_s11 + $0x20] sm:$0xff] %v1547_v36  ;;  %v1529_v40 = vmul.f32 %v1521_v38, %v1501_v16  ;;  %v1530_v41 = vmul.f32 %v1522_v39, %v1502_v35 }
 0x37a   : > { %1556 = vst [vmem:[%s2666_s11 + $0x28] sm:$0xff] %v1548_v37 }
 0x37b   : > { %v1549_v42 = vadd.f32 %v1536_v18, %v1529_v40  ;;  %v1550_v43 = vadd.f32 %v1540_v58, %v1530_v41 }
 0x37d   : > { %1557 = vst [vmem:[%s2666_s11 + $0x30] sm:$0xff] %v1549_v42  ;;  %1558 = vst [vmem:[%s2666_s11 + $0x38] sm:$0xff] %v1550_v43 }
 0x37e   : > { %s2780_s30 = smov (!%p1569_p10, %s1568_s30), 4 }
 0x37f   : > { %s2682_s14 = sshll.u32 %s2780_s30, 8 }
 0x380   : > { %s1574_s23 = ssub.s32 1024, %s2682_s14 }
 0x381   : > { %1575 = vsyncadd %s1560_s16, %s1574_s23  ;;  %p1821_p1 = scmp.ne.s32.totalorder %s2682_s14, 0  ;;  %s1830_s13 = sshll.u32 %s2367_s28, 10 }
 0x382   : > { %s2692_s15 = scalar_lea.hbm %s2748_s7, %s1830_s13  ;;  %s1581_s18 = sshll.u32 %s2666_s11, 4  ;;  %s2695_s18 = int_to_ptr.vmem [resolvable:$true] %s1581_s18 }
 0x383   : > { %s2224_s21 = scalar_lea.vmem %s2695_s18, %s2682_s14  ;;  %s2303_s9 = smov [#allocation8]  }
 0x384   : > { %p2225_p3 = scmp.ne.s32.totalorder %s2695_s18, %s2224_s21  ;;  %s2228_s17 = sshll.u32 %s2303_s9, 4  ;;  %s2229_s17 = int_to_ptr.vmem [resolvable:$false] %s2228_s17 }
 0x385   : > { %s2230_s28 = scalar_lea.vmem %s2229_s17, 2048  ;;  %p2231_p11 = scmp.lt.s32.totalorder %s2695_s18, %s2229_s17 }
 0x386   : > { %p2226_p5 = pnand %p2225_p3, %p1821_p1  ;;  %p2232_p13 = scmp.lt.s32.totalorder %s2230_s28, %s2224_s21 }
 0x388   : > { %p2227_p6 = pneg %p2226_p5  ;;  %p2233_p0 = por %p2232_p13, %p2231_p11 }
 0x38a   : > { %p2234_p12 = pnand %p2233_p0, %p2227_p6 }
 0x38c   : > { %2237 = shalt.err (!%p2234_p12)
}
 0x38d   : > { %s2238_s8 = scalar_lea.hbm %s2692_s15, %s2682_s14  ;;  %s2242_s11 = scalar_lea.hbm %s2748_s7, 1792 }
 0x38e   : > { %p2239_p7 = scmp.ne.s32.totalorder %s2692_s15, %s2238_s8  ;;  %p2243_p9 = scmp.lt.u32.totalorder %s2692_s15, %s2748_s7 }
 0x38f   : > { %p2244_p10 = scmp.lt.u32.totalorder %s2242_s11, %s2238_s8  ;;  %p2246_p5 = scmp.lt.u32.totalorder %s2238_s8, %s2692_s15 }
 0x390   : > { %p2240_p2 = pnand %p2239_p7, %p1821_p1 }
 0x391   : > { %p2245_p3 = por %p2244_p10, %p2243_p9 }
 0x392   : > { %p2241_p8 = pneg %p2240_p2 }
 0x393   : > { %p2247_p6 = por %p2246_p5, %p2245_p3 }
 0x395   : > { %p2248_p11 = pnand %p2247_p6, %p2241_p8 }
 0x397   : > { %2251 = shalt.err (!%p2248_p11)
}
 0x398   : > { %s2304_s23 = smov 256   ;;  %s2305_s13 = smov 16  }
 0x399   : > { %1587 = dma.vmem_to_hbm [thread:$0]  (%p1821_p1), %s2695_s18, %s2682_s14, %s2692_s15, %s1560_s16, %s2304_s23, %s2304_s23, %s2305_s13  }
 0x39a PF: > { %s2770_s29 = sld [smem:[#allocation14_spill]]  ;;  %s1596_s12 = sand.u32 1, %s2282_s24  }
 0x39b   : > { %s1597_s21 = scalar_lea.sflag [#allocation4], %s1596_s12 }
 0x3a0   : > { %p2771_p13 = scmp.ne.s32.totalorder %s2770_s29, 0 }
 0x3a2   : > { %p1876_p0 = pnand %p1677_p4, %p2771_p13 }
 0x3a4   : > { %2277 = dma.done.wait (!%p1876_p0), %s1597_s21, 1024  }
 0x3a5   : > { %2279 = vsyncadd (!%p1876_p0), %s1597_s21, 4294966272  ;;  %s2772_s27 = sld [smem:[#allocation12_spill]]  ;;  %s2773_s9 = sld [smem:[#allocation13_spill]] }
 0x3a6   : > { %s2774_s24 = smov %s2286_s25  ;;  %s2775_s25 = smov %s2290_s26 }
 0x3ab   : > { %p21_p12 = scmp.ge.s32.totalorder %s2772_s27, 4   ;;  %s2776_s26 = smov %s2773_s9 }
 0x3ad   :  { %23 = sbr.rel (!%p21_p12) target bundleno = 6 (0x6), region = 101 }
 0x3b4   :  { %1602 = vsyncpa [#allocation3], 1 }
 0x3b5   :  { %1604 = vsyncpa [#allocation3 + $0x1], 1 }
 0x3b6   :  { %1605 = vsyncpa [#allocation6], 1 }
 0x3b7   :  { %1606 = vsyncpa [#allocation4], 1 }
 0x3b8   :  { %1608 = vsyncpa [#allocation4 + $0x1], 1 }

</bundles_post_ra>
